<compile_context>
chip_gen: v5e
topology: v5e:2x2
jax: 0.10.0
libtpu: 0.0.40
codegen_flags: <defaults>
</compile_context>

<pallas_src>
import jax
import jax.numpy as jnp
from jax.experimental import pallas as pl
from jax.experimental.pallas import tpu as pltpu

# ---------------------------------------------------------------------------
# Static problem / packing layout (module spec: 4 -> 8 -> 9 -> 3).
# ---------------------------------------------------------------------------
IN_F, H1_F, H2_F, OUT_F = 4, 8, 9, 3
H2_PAD = 16          # pad 9 -> 16 (zero cols/rows; contributes 0 to the dots)
LANES = 128          # lane width of the packed parameter slab

# Row offsets inside the packed slab (all multiples of 8 for clean sublanes).
W1_ROW, B1_ROW = 0, 8        # W1^T: rows [0, 4),  b1: row 8
W2_ROW, B2_ROW = 16, 24      # W2^T: rows [16,24), b2: row 24
W3_ROW, B3_ROW = 32, 48      # W3^T: rows [32,48), b3: row 48
PARAM_ROWS = 56              # multiple of 8; 56*128*4 B = 28 KiB


def pack_params(w1, b1, w2, b2, w3, b3):
    """One-time (init-time) packing: transpose, zero-pad, concatenate.

    Weights come in PyTorch layout (out_features, in_features); biases (out,).
    Returns a single (PARAM_ROWS, 128) f32 slab.
    """
    slab = jnp.zeros((PARAM_ROWS, LANES), jnp.float32)
    slab = slab.at[W1_ROW:W1_ROW + IN_F, 0:H1_F].set(w1.T.astype(jnp.float32))
    slab = slab.at[B1_ROW, 0:H1_F].set(b1.astype(jnp.float32))
    slab = slab.at[W2_ROW:W2_ROW + H1_F, 0:H2_F].set(w2.T.astype(jnp.float32))
    slab = slab.at[B2_ROW, 0:H2_F].set(b2.astype(jnp.float32))
    slab = slab.at[W3_ROW:W3_ROW + H2_F, 0:OUT_F].set(w3.T.astype(jnp.float32))
    slab = slab.at[B3_ROW, 0:OUT_F].set(b3.astype(jnp.float32))
    return slab


# ---------------------------------------------------------------------------
# Kernel: one batch tile per grid step; params slab resident in VMEM.
# ---------------------------------------------------------------------------
def mlp_kernel(x_ref, p_ref, o_ref):
    x = x_ref[...]                                           # (TB, 4)

    w1 = p_ref[W1_ROW:W1_ROW + IN_F,   0:H1_F]               # (4, 8)
    b1 = p_ref[B1_ROW:B1_ROW + 1,      0:H1_F]               # (1, 8)
    w2 = p_ref[W2_ROW:W2_ROW + H1_F,   0:H2_PAD]             # (8, 16)
    b2 = p_ref[B2_ROW:B2_ROW + 1,      0:H2_PAD]             # (1, 16)
    w3 = p_ref[W3_ROW:W3_ROW + H2_PAD, 0:OUT_F]              # (16, 3)
    b3 = p_ref[B3_ROW:B3_ROW + 1,      0:OUT_F]              # (1, 3)

    h1 = jnp.maximum(
        jnp.dot(x, w1, preferred_element_type=jnp.float32) + b1, 0.0)
    h2 = jnp.maximum(
        jnp.dot(h1, w2, preferred_element_type=jnp.float32) + b2, 0.0)
    y = jnp.dot(h2, w3, preferred_element_type=jnp.float32) + b3
    o_ref[...] = y.astype(o_ref.dtype)


def mlp_forward(x, packed_params, *, block_rows=512):
    """x: (B, 4) float32; packed_params: (PARAM_ROWS, 128) slab from pack_params."""
    orig_b = x.shape[0]
    tb = block_rows if orig_b > block_rows else orig_b
    if orig_b % tb != 0:                      # static check; glue only if needed
        x = jnp.pad(x, ((0, (-orig_b) % tb), (0, 0)))
    b = x.shape[0]
    grid = (b // tb,)

    cost = pl.CostEstimate(
        flops=2 * b * (IN_F * H1_F + H1_F * H2_PAD + H2_PAD * OUT_F),
        transcendentals=0,
        bytes_accessed=(b * IN_F + PARAM_ROWS * LANES + b * OUT_F) * 4,
    )

    y = pl.pallas_call(
        mlp_kernel,
        out_shape=jax.ShapeDtypeStruct((b, OUT_F), jnp.float32),
        grid=grid,
        in_specs=[
            pl.BlockSpec((tb, IN_F), lambda i: (i, 0)),
            # Constant block index -> the slab is DMA'd once and stays resident.
            pl.BlockSpec((PARAM_ROWS, LANES), lambda i: (0, 0)),
        ],
        out_specs=pl.BlockSpec((tb, OUT_F), lambda i: (i, 0)),
        compiler_params=pltpu.CompilerParams(
            dimension_semantics=("parallel",)),   # megacore split on v7x
        cost_estimate=cost,
    )(x, packed_params)

    return y if b == orig_b else y[:orig_b]


# ---------------------------------------------------------------------------
# Init / reference (PyTorch nn.Linear semantics) and demo.
# ---------------------------------------------------------------------------
def init_params(key, in_features=IN_F, h1=H1_F, h2=H2_F, out_features=OUT_F):
    """Mimics nn.Linear's U(-1/sqrt(fan_in), 1/sqrt(fan_in)) init."""
    ks = jax.random.split(key, 6)

    def linear(kw, kb, fan_in, fan_out):
        bound = 1.0 / jnp.sqrt(jnp.float32(fan_in))
        w = jax.random.uniform(kw, (fan_out, fan_in), jnp.float32, -bound, bound)
        b = jax.random.uniform(kb, (fan_out,), jnp.float32, -bound, bound)
        return w, b

    w1, b1 = linear(ks[0], ks[1], in_features, h1)
    w2, b2 = linear(ks[2], ks[3], h1, h2)
    w3, b3 = linear(ks[4], ks[5], h2, out_features)
    return w1, b1, w2, b2, w3, b3


def reference_forward(x, w1, b1, w2, b2, w3, b3):
    h = jnp.maximum(x @ w1.T + b1, 0.0)
    h = jnp.maximum(h @ w2.T + b2, 0.0)
    return h @ w3.T + b3


if __name__ == "__main__":
    key = jax.random.PRNGKey(0)
    k_x, k_p = jax.random.split(key)

    batch = 128                      # small Iris-like batch of 4-feature rows
    x = jax.random.uniform(k_x, (batch, IN_F), jnp.float32, 0.0, 8.0)

    params = init_params(k_p)
    packed = pack_params(*params)    # one-time packing (not in the hot path)
    packed = jax.block_until_ready(packed)

    # block_rows=64 -> 2 grid steps, exercises the batch-tiled pipeline.
    y = mlp_forward(x, packed, block_rows=64)
    y = jax.block_until_ready(y)

    y_ref = reference_forward(x, *params)
    assert y.shape == (batch, OUT_F)
    assert jnp.allclose(y, y_ref, atol=1e-4, rtol=1e-4), "mismatch vs reference"

    print("KERNEL_OK")
</pallas_src>

<mosaic_0001>
module attributes {stable_mosaic.version = 11 : i64} {
  func.func @mlp_kernel(%arg0: i32, %arg1: memref<64x4xf32, #tpu.memory_space<vmem>>, %arg2: memref<56x128xf32, #tpu.memory_space<vmem>>, %arg3: memref<64x3xf32, #tpu.memory_space<vmem>>) attributes {dimension_semantics = [#tpu.dimension_semantics<parallel>], iteration_bounds = array<i64: 2>, scalar_prefetch = 0 : i64, scratch_operands = 0 : i64, tpu.core_type = #tpu.core_type<tc>, window_params = [{transform_indices = @transform_0, window_bounds = array<i64: 64, 4>}, {pipeline_mode = #tpu.pipeline_mode<synchronous>, transform_indices = @transform_1, window_bounds = array<i64: 56, 128>}, {transform_indices = @transform_2, window_bounds = array<i64: 64, 3>}]} {
    %c0 = arith.constant 0 : index
    %c0_0 = arith.constant 0 : index
    %0 = vector.load %arg1[%c0, %c0_0] : memref<64x4xf32, #tpu.memory_space<vmem>>, vector<64x4xf32>
    %c0_1 = arith.constant 0 : index
    %c0_2 = arith.constant 0 : index
    %1 = vector.load %arg2[%c0_1, %c0_2] : memref<56x128xf32, #tpu.memory_space<vmem>>, vector<4x8xf32>
    %c8 = arith.constant 8 : index
    %c0_3 = arith.constant 0 : index
    %2 = vector.load %arg2[%c8, %c0_3] : memref<56x128xf32, #tpu.memory_space<vmem>>, vector<1x8xf32>
    %c16 = arith.constant 16 : index
    %c0_4 = arith.constant 0 : index
    %3 = vector.load %arg2[%c16, %c0_4] : memref<56x128xf32, #tpu.memory_space<vmem>>, vector<8x16xf32>
    %c24 = arith.constant 24 : index
    %c0_5 = arith.constant 0 : index
    %4 = vector.load %arg2[%c24, %c0_5] : memref<56x128xf32, #tpu.memory_space<vmem>>, vector<1x16xf32>
    %c32 = arith.constant 32 : index
    %c0_6 = arith.constant 0 : index
    %5 = vector.load %arg2[%c32, %c0_6] : memref<56x128xf32, #tpu.memory_space<vmem>>, vector<16x3xf32>
    %c48 = arith.constant 48 : index
    %c0_7 = arith.constant 0 : index
    %6 = vector.load %arg2[%c48, %c0_7] : memref<56x128xf32, #tpu.memory_space<vmem>>, vector<1x3xf32>
    %cst = arith.constant dense<0.000000e+00> : vector<64x8xf32>
    %7 = tpu.matmul %0, %1, %cst {dimension_numbers = #tpu.dot_dimension_numbers<[1], [0], [0], [1], [0, 0, 1, 1], [], []>} : vector<64x4xf32>, vector<4x8xf32>, vector<64x8xf32> -> vector<64x8xf32>
    %8 = vector.broadcast %2 : vector<1x8xf32> to vector<64x8xf32>
    %9 = arith.addf %7, %8 : vector<64x8xf32>
    %cst_8 = arith.constant 0.000000e+00 : f32
    %10 = vector.broadcast %cst_8 : f32 to vector<64x8xf32>
    %11 = arith.maximumf %9, %10 : vector<64x8xf32>
    %cst_9 = arith.constant dense<0.000000e+00> : vector<64x16xf32>
    %12 = tpu.matmul %11, %3, %cst_9 {dimension_numbers = #tpu.dot_dimension_numbers<[1], [0], [0], [1], [0, 0, 1, 1], [], []>} : vector<64x8xf32>, vector<8x16xf32>, vector<64x16xf32> -> vector<64x16xf32>
    %13 = vector.broadcast %4 : vector<1x16xf32> to vector<64x16xf32>
    %14 = arith.addf %12, %13 : vector<64x16xf32>
    %cst_10 = arith.constant 0.000000e+00 : f32
    %15 = vector.broadcast %cst_10 : f32 to vector<64x16xf32>
    %16 = arith.maximumf %14, %15 : vector<64x16xf32>
    %cst_11 = arith.constant dense<0.000000e+00> : vector<64x3xf32>
    %17 = tpu.matmul %16, %5, %cst_11 {dimension_numbers = #tpu.dot_dimension_numbers<[1], [0], [0], [1], [0, 0, 1, 1], [], []>} : vector<64x16xf32>, vector<16x3xf32>, vector<64x3xf32> -> vector<64x3xf32>
    %18 = vector.broadcast %6 : vector<1x3xf32> to vector<64x3xf32>
    %19 = arith.addf %17, %18 : vector<64x3xf32>
    %c0_12 = arith.constant 0 : index
    %c0_13 = arith.constant 0 : index
    %20 = vector.load %arg3[%c0_12, %c0_13] : memref<64x3xf32, #tpu.memory_space<vmem>>, vector<64x3xf32>
    tpu.vector_store %arg3[%c0_12, %c0_13], %19 {strides = array<i32>} : memref<64x3xf32, #tpu.memory_space<vmem>>, vector<64x3xf32>,
    return
  }
  func.func @transform_0(%arg0: i32) -> (i32, i32) {
    %c0_i32 = arith.constant 0 : i32
    %c0_i32_0 = arith.constant 0 : i32
    return %arg0, %c0_i32 : i32, i32
  }
  func.func @transform_1(%arg0: i32) -> (i32, i32) {
    %c0_i32 = arith.constant 0 : i32
    %c0_i32_0 = arith.constant 0 : i32
    %c0_i32_1 = arith.constant 0 : i32
    return %c0_i32, %c0_i32_0 : i32, i32
  }
  func.func @transform_2(%arg0: i32) -> (i32, i32) {
    %c0_i32 = arith.constant 0 : i32
    %c0_i32_0 = arith.constant 0 : i32
    return %arg0, %c0_i32 : i32, i32
  }
}

</mosaic_0001>

<bundles_post_ra>
// kernel: tpu_custom_call.1
= control target key start
LH: loop header
LB: loop body
LE: loop exit
PB: predicated region body
PF: predicated region fallthrough
CT: control target
= control target key end

     0   :  { %s522_s9 = smov 0   ;;  %s599_s0 = inlined_call_operand.vmem [shape: f32[128,4], index: 0, kind: input, shape index: {}]   ;;  %s600_s1 = inlined_call_operand.vmem [shape: f32[56,128], index: 1, kind: input, shape index: {}]   ;;  %s601_s2 = inlined_call_operand.vmem [shape: f32[128,3], index: 2, kind: output, shape index: {}]  }
   0x1 LB: > { %s448_s10 = sadd.s32 4294967295, %s505_s9   ;;  %p452_p0 = scmp.ge.s32.totalorder %s505_s9, 1  ;;  %s505_s9 = sphi %s522_s9, %s12_s9  }
   0x2   : > { %p113_p1 = scmp.lt.s32.totalorder %s505_s9, 3 }
   0x4   : > { %p114_p2 = pnand %p452_p0, %p113_p1 }
   0x5   : > { %s453_s13 = sshll.u32 (!%p114_p2), %s448_s10, 3 }
   0x6   : > { %117 = sbr.rel (%p114_p2) target bundleno = 450 (0x1c2), region = 28  ;;  %p136_p3 = scmp.lt.s32.totalorder (!%p114_p2), %s453_s13, 15 }
   0xb   : > { %v155_v0 = vld [vmem:[%s600_s1] sm:$0xf]  ;;  %vm188_vm0 = vcmask 1043456   ;;  %s603_s13 = smov (!%p136_p3, %s453_s13), 15  ;;  %vm163_vm1 = vcmask 31744   ;;  %v157_v9 = vld [vmem:[%s600_s1 + $0x10] sm:$0xff] }
   0xc   : > { %457 = vmatpush.msk.msra.mxu0 %vm188_vm0, %v155_v0  ;;  %484 = vmatpush.msk.msra.mxu3 %vm188_vm0, %v155_v0  ;;  %s454_s14 = sshll.u32 %s603_s13, 3  ;;  %v496_v10 = vld [vmem:[%s600_s1 + $0x8] ss:$0 sm:$0xff]  ;;  %vm242_vm2 = vcmask 64512   ;;  %v159_v36 = vld [vmem:[%s600_s1 + $0x20] sm:$0xff]  ;;  %vm317_vm3 = vcmask 130048  }
   0xd   : > { %s139_s17 = scalar_lea.vmem %s599_s0, %s454_s14  ;;  %282 = vmatpush.msra.mxu1 %v157_v9  ;;  %v160_v35 = vld [vmem:[%s600_s1 + $0x28] sm:$0xff]  ;;  %v497_v37 = vld [vmem:[%s600_s1 + $0x18] ss:$0 sm:$0xff]  ;;  %v498_v62 = vld [vmem:[%s600_s1 + $0x30] ss:$0 sm:$0xff]  ;;  %s145_s4 = scalar_lea.vmem %s601_s2, %s454_s14  ;;  %vm383_vm4 = vcmask 23552  }
   0xe   : > { %v147_v1 = vld [vmem:[%s139_s17] sm:$0xff]  ;;  %v153_v2 = vld [vmem:[%s139_s17 + $0x30] sm:$0xff]  ;;  %v148_v3 = vld [vmem:[%s139_s17 + $0x8] sm:$0xff]  ;;  %485 = vmatpush.msrb.mxu3 %v157_v9  ;;  %356 = vmatpush.msra.mxu2 %v160_v35 }
   0xf   : > { %458 = vmatmul.msk.f32.vlgmr.msra.gmra.mxu0 %vm163_vm1, %v147_v1  ;;  %464 = vmatmul.msk.f32.vlgmr.msra.gmra.mxu3 %vm163_vm1, %v153_v2  ;;  %v154_v4 = vld [vmem:[%s139_s17 + $0x38] sm:$0xff]  ;;  %v149_v5 = vld [vmem:[%s139_s17 + $0x10] sm:$0xff]  ;;  %v151_v7 = vld [vmem:[%s139_s17 + $0x20] sm:$0xff] }
  0x10   : > { %v150_v6 = vld [vmem:[%s139_s17 + $0x18] sm:$0xff]  ;;  %v152_v8 = vld [vmem:[%s139_s17 + $0x28] sm:$0xff]  ;;  %486 = vmatpush.msra.mxu3 %v160_v35  ;;  %357 = vmatpush.msra.mxu2 %v159_v36 }
  0x12   : > { %487 = vmatpush.msra.mxu3 %v159_v36 }
  0x17   : > { %459 = vmatmul.msk.f32.gmra.mxu0 %vm163_vm1, %v148_v3  ;;  %465 = vmatmul.msk.f32.gmra.mxu3 %vm163_vm1, %v154_v4 }
  0x1f   : > { %460 = vmatmul.msk.f32.gmra.mxu0 %vm163_vm1, %v149_v5 }
  0x27   : > { %461 = vmatmul.msk.f32.gmra.mxu0 %vm163_vm1, %v150_v6 }
  0x2f   : > { %462 = vmatmul.msk.f32.gmra.mxu0 %vm163_vm1, %v151_v7 }
  0x37   : > { %463 = vmatmul.msk.f32.gmra.mxu0 %vm163_vm1, %v152_v8 }
  0x8c   : > { %v209_v11 = vpop.f32.mrf.mxu0 }
  0x8d   : > { %v210_v12 = vadd.f32 %v496_v10, %v209_v11 }
  0x8f   : > { %v233_v13 = vmax.f32 %v210_v12, 0.0 }
  0x91   : > { %466 = vmatmul.msk.f32.vlgmr.msra.gmra.mxu1 %vm242_vm2, %v233_v13 }
  0x92   : > { %v227_v14 = vpop.f32.mrf.mxu3 }
  0x93   : > { %v228_v16 = vadd.f32 %v496_v10, %v227_v14 }
  0x94   : > { %v212_v15 = vpop.f32.mrf.mxu0 }
  0x95   : > { %v213_v17 = vadd.f32 %v496_v10, %v212_v15  ;;  %v239_v18 = vmax.f32 %v228_v16, 0.0 }
  0x97   : > { %v234_v19 = vmax.f32 %v213_v17, 0.0  ;;  %472 = vmatmul.msk.f32.vlgmr.msrb.gmra.mxu3 %vm242_vm2, %v239_v18 }
  0x99   : > { %467 = vmatmul.msk.f32.gmra.mxu1 %vm242_vm2, %v234_v19 }
  0x9a   : > { %v230_v20 = vpop.f32.mrf.mxu3 }
  0x9b   : > { %v231_v22 = vadd.f32 %v496_v10, %v230_v20 }
  0x9c   : > { %v215_v21 = vpop.f32.mrf.mxu0 }
  0x9d   : > { %v216_v23 = vadd.f32 %v496_v10, %v215_v21  ;;  %v240_v24 = vmax.f32 %v231_v22, 0.0 }
  0x9f   : > { %v235_v25 = vmax.f32 %v216_v23, 0.0  ;;  %473 = vmatmul.msk.f32.gmra.mxu3 %vm242_vm2, %v240_v24 }
  0xa1   : > { %468 = vmatmul.msk.f32.gmra.mxu1 %vm242_vm2, %v235_v25 }
  0xa4   : > { %v218_v26 = vpop.f32.mrf.mxu0 }
  0xa5   : > { %v219_v27 = vadd.f32 %v496_v10, %v218_v26 }
  0xa7   : > { %v236_v28 = vmax.f32 %v219_v27, 0.0 }
  0xa9   : > { %469 = vmatmul.msk.f32.gmra.mxu1 %vm242_vm2, %v236_v28 }
  0xac   : > { %v221_v29 = vpop.f32.mrf.mxu0 }
  0xad   : > { %v222_v30 = vadd.f32 %v496_v10, %v221_v29 }
  0xaf   : > { %v237_v31 = vmax.f32 %v222_v30, 0.0 }
  0xb1   : > { %470 = vmatmul.msk.f32.gmra.mxu1 %vm242_vm2, %v237_v31 }
  0xb4   : > { %v224_v32 = vpop.f32.mrf.mxu0 }
  0xb5   : > { %v225_v33 = vadd.f32 %v496_v10, %v224_v32 }
  0xb7   : > { %v238_v34 = vmax.f32 %v225_v33, 0.0 }
  0xb9   : > { %471 = vmatmul.msk.f32.gmra.mxu1 %vm242_vm2, %v238_v34 }
 0x10e   : > { %v284_v38 = vpop.f32.mrf.mxu1 }
 0x10f   : > { %v285_v39 = vadd.f32 %v497_v37, %v284_v38 }
 0x111   : > { %v308_v40 = vmax.f32 %v285_v39, 0.0 }
 0x113   : > { %474 = vmatmul.msk.f32.vlgmr.msra.gmra.mxu2 %vm317_vm3, %v308_v40 }
 0x116   : > { %v287_v41 = vpop.f32.mrf.mxu1 }
 0x117   : > { %v288_v42 = vadd.f32 %v497_v37, %v287_v41 }
 0x119   : > { %v309_v43 = vmax.f32 %v288_v42, 0.0 }
 0x11a   : > { %v302_v44 = vpop.f32.mrf.mxu3 }
 0x11b   : > { %475 = vmatmul.msk.f32.gmra.mxu2 %vm317_vm3, %v309_v43  ;;  %v303_v45 = vadd.f32 %v497_v37, %v302_v44 }
 0x11d   : > { %v314_v47 = vmax.f32 %v303_v45, 0.0 }
 0x11e   : > { %v290_v46 = vpop.f32.mrf.mxu1 }
 0x11f   : > { %v291_v48 = vadd.f32 %v497_v37, %v290_v46  ;;  %480 = vmatmul.msk.f32.vlgmr.msra.gmra.mxu3 %vm317_vm3, %v314_v47 }
 0x121   : > { %v310_v49 = vmax.f32 %v291_v48, 0.0 }
 0x122   : > { %v305_v50 = vpop.f32.mrf.mxu3 }
 0x123   : > { %476 = vmatmul.msk.f32.gmra.mxu2 %vm317_vm3, %v310_v49  ;;  %v306_v51 = vadd.f32 %v497_v37, %v305_v50 }
 0x125   : > { %v315_v53 = vmax.f32 %v306_v51, 0.0 }
 0x126   : > { %v293_v52 = vpop.f32.mrf.mxu1 }
 0x127   : > { %v294_v54 = vadd.f32 %v497_v37, %v293_v52  ;;  %481 = vmatmul.msk.f32.gmra.mxu3 %vm317_vm3, %v315_v53 }
 0x129   : > { %v311_v55 = vmax.f32 %v294_v54, 0.0 }
 0x12b   : > { %477 = vmatmul.msk.f32.gmra.mxu2 %vm317_vm3, %v311_v55 }
 0x12e   : > { %v296_v56 = vpop.f32.mrf.mxu1 }
 0x12f   : > { %v297_v57 = vadd.f32 %v497_v37, %v296_v56 }
 0x131   : > { %v312_v58 = vmax.f32 %v297_v57, 0.0 }
 0x133   : > { %478 = vmatmul.msk.f32.gmra.mxu2 %vm317_vm3, %v312_v58 }
 0x136   : > { %v299_v59 = vpop.f32.mrf.mxu1 }
 0x137   : > { %v300_v60 = vadd.f32 %v497_v37, %v299_v59 }
 0x139   : > { %v313_v61 = vmax.f32 %v300_v60, 0.0 }
 0x13b   : > { %479 = vmatmul.msk.f32.gmra.mxu2 %vm317_vm3, %v313_v61 }
 0x196   : > { %v359_v63 = vpop.f32.mrf.mxu2 }
 0x197   : > { %v360_v0 = vadd.f32 %v498_v62, %v359_v63 }
 0x199   : > { %384 = vst.msk [vmem:[%s145_s4] sm:$0xff] %vm383_vm4, %v360_v0 }
 0x19e   : > { %v362_v1 = vpop.f32.mrf.mxu2 }
 0x19f   : > { %v363_v2 = vadd.f32 %v498_v62, %v362_v1 }
 0x1a1   : > { %385 = vst.msk [vmem:[%s145_s4 + $0x8] sm:$0xff] %vm383_vm4, %v363_v2 }
 0x1a2   : > { %v377_v3 = vpop.f32.mrf.mxu3 }
 0x1a3   : > { %v378_v4 = vadd.f32 %v498_v62, %v377_v3 }
 0x1a5   : > { %390 = vst.msk [vmem:[%s145_s4 + $0x30] sm:$0xff] %vm383_vm4, %v378_v4 }
 0x1a6   : > { %v365_v5 = vpop.f32.mrf.mxu2 }
 0x1a7   : > { %v366_v6 = vadd.f32 %v498_v62, %v365_v5 }
 0x1a9   : > { %386 = vst.msk [vmem:[%s145_s4 + $0x10] sm:$0xff] %vm383_vm4, %v366_v6 }
 0x1aa   : > { %v380_v7 = vpop.f32.mrf.mxu3 }
 0x1ab   : > { %v381_v8 = vadd.f32 %v498_v62, %v380_v7 }
 0x1ad   : > { %391 = vst.msk [vmem:[%s145_s4 + $0x38] sm:$0xff] %vm383_vm4, %v381_v8 }
 0x1ae   : > { %v368_v9 = vpop.f32.mrf.mxu2 }
 0x1af   : > { %v369_v10 = vadd.f32 %v498_v62, %v368_v9 }
 0x1b1   : > { %387 = vst.msk [vmem:[%s145_s4 + $0x18] sm:$0xff] %vm383_vm4, %v369_v10 }
 0x1b6   : > { %v371_v11 = vpop.f32.mrf.mxu2 }
 0x1b7   : > { %v372_v12 = vadd.f32 %v498_v62, %v371_v11 }
 0x1b9   : > { %388 = vst.msk [vmem:[%s145_s4 + $0x20] sm:$0xff] %vm383_vm4, %v372_v12 }
 0x1be   : > { %v374_v13 = vpop.f32.mrf.mxu2 }
 0x1bf   : > { %v375_v14 = vadd.f32 %v498_v62, %v374_v13 }
 0x1c1   : > { %389 = vst.msk [vmem:[%s145_s4 + $0x28] sm:$0xff] %vm383_vm4, %v375_v14 }
 0x1c2 PF: > { %s12_s9 = sadd.s32 1, %s505_s9  }
 0x1c3   : > { %p9_p4 = scmp.ge.s32.totalorder %s12_s9, 4  }
 0x1c5   :  { %11 = sbr.rel (!%p9_p4) target bundleno = 1 (0x1), region = 58 }

</bundles_post_ra>
